<compile_context>
chip_gen: v6e
topology: v6e:2x2x1
jax: 0.10.0
libtpu: 0.0.40
codegen_flags: <defaults>
</compile_context>

<pallas_src>
import jax
import jax.numpy as jnp
from jax.experimental import pallas as pl
from jax.experimental.pallas import tpu as pltpu


def _round_up(v, m):
    return ((v + m - 1) // m) * m


def adapter_kernel(x_ref, w1t_ref, w2t_ref, o_ref):
    # x_ref: (tm, c_in)   w1t_ref: (c_in, c_hid)   w2t_ref: (c_hid, c_in)
    xv = x_ref[...].astype(w1t_ref.dtype)          # VPU cast; no extra HBM pass
    h = jnp.dot(xv, w1t_ref[...], preferred_element_type=jnp.float32)
    h = jnp.maximum(h, 0.0)                        # ReLU fused on f32 accumulator
    y = jnp.dot(h.astype(w2t_ref.dtype), w2t_ref[...],
                preferred_element_type=jnp.float32)
    o_ref[...] = jnp.maximum(y, 0.0).astype(o_ref.dtype)


def adapter_forward(x, w1, w2, *, block_rows=1024, compute_dtype=None,
                    x_buffers=2):
    """Adapter forward.

    x : (N, c_in)         activations
    w1: (c_hid, c_in)     first Linear weight (PyTorch layout)
    w2: (c_in, c_hid)     second Linear weight (PyTorch layout)
    compute_dtype: dtype fed to the MXU (jnp.bfloat16 recommended on
      v5e/v6e/v7x); accumulation stays f32; output is emitted in this dtype.
    """
    n, c_in = x.shape
    c_hid = w1.shape[0]
    assert w1.shape == (c_hid, c_in) and w2.shape == (c_in, c_hid)

    cdt = jnp.dtype(compute_dtype) if compute_dtype is not None else jnp.dtype(x.dtype)
    itemsize = cdt.itemsize

    # One-time layout change + cast in the wrapper (amortized over all batch
    # tiles; upstream code should ideally store the weights this way already).
    w1t = w1.T.astype(cdt)                         # (c_in, c_hid)
    w2t = w2.T.astype(cdt)                         # (c_hid, c_in)

    # ---- VMEM budgeting (v7x: 64 MiB physical per core). ----
    VMEM_BUDGET = 40 << 20
    w_resident = 2 * c_in * c_hid * itemsize       # w1t + w2t, one copy each
    # Constant-index blocks are still double-buffered by default; single-buffer
    # large weights since their block never changes.
    weight_bufs = 1 if 2 * w_resident > VMEM_BUDGET // 2 else 2
    w_vmem = weight_bufs * w_resident

    def _tile_bytes(t):
        io = 2 * 2 * t * c_in * itemsize           # x + out tiles, double-buffered
        interm = t * (c_hid + c_in) * 4            # f32 intermediates h, y
        return io + interm

    # Row tile: multiple of 16 sublanes (covers bf16 packing), >=2 grid steps
    # when possible (pipelining + v7x megacore), capped by block_rows and the
    # VMEM budget. The partial last block is handled by Pallas masked stores.
    row_align = 16
    block_rows = max(row_align, _round_up(block_rows, row_align))
    if n <= row_align:
        tm = n                                     # block == full dim, grid=(1,)
    else:
        tm = min(block_rows, _round_up(pl.cdiv(n, 2), row_align))
        tm = min(tm, _round_up(n, row_align))
        while tm > row_align and w_vmem + _tile_bytes(tm) > VMEM_BUDGET:
            tm = _round_up(max(row_align, tm // 2), row_align)
    # TODO(synk): for c_in so large that even single-buffered weights exceed
    # v7x's 64 MiB VMEM, switch to a K-tiled grid axis with a VMEM accumulator.

    grid = (pl.cdiv(n, tm),)
    vmem_limit = int(min(max(2 * (w_vmem + _tile_bytes(tm)), 32 << 20), 60 << 20))

    x_kwargs = {} if x_buffers == 2 else {"pipeline_mode": pl.Buffered(x_buffers)}
    w_kwargs = {} if weight_bufs == 2 else {"pipeline_mode": pl.Buffered(weight_bufs)}

    flops = 2 * n * c_in * c_hid * 2               # two matmuls
    bytes_accessed = int(x.size * jnp.dtype(x.dtype).itemsize
                         + (w1t.size + w2t.size + n * c_in) * itemsize)

    return pl.pallas_call(
        adapter_kernel,
        out_shape=jax.ShapeDtypeStruct((n, c_in), cdt),
        grid_spec=pltpu.PrefetchScalarGridSpec(
            num_scalar_prefetch=0,
            grid=grid,
            in_specs=[
                # x tile: pipelined along the batch grid axis.
                pl.BlockSpec((tm, c_in), lambda i: (i, 0), **x_kwargs),
                # Weights: constant block index -> resident in VMEM.
                pl.BlockSpec((c_in, c_hid), lambda i: (0, 0), **w_kwargs),
                pl.BlockSpec((c_hid, c_in), lambda i: (0, 0), **w_kwargs),
            ],
            out_specs=pl.BlockSpec((tm, c_in), lambda i: (i, 0)),
        ),
        compiler_params=pltpu.CompilerParams(
            dimension_semantics=("parallel",),     # batch tiles are independent
            vmem_limit_bytes=vmem_limit,
        ),
        cost_estimate=pl.CostEstimate(
            flops=flops, transcendentals=0, bytes_accessed=bytes_accessed),
    )(x, w1t, w2t)


if __name__ == "__main__":
    # Small, lane-dense shapes consistent with the module; batch deliberately
    # NOT a multiple of the row tile to exercise the masked partial last block.
    batch = 300
    c_in = 256
    reduction = 4
    c_hid = c_in // reduction  # 64

    key = jax.random.PRNGKey(0)
    kx, k1, k2 = jax.random.split(key, 3)

    x = jax.random.normal(kx, (batch, c_in), dtype=jnp.float32)
    # Deterministic weight init (roughly Kaiming-uniform scale, like nn.Linear).
    w1 = jax.random.uniform(k1, (c_hid, c_in), jnp.float32, -1.0, 1.0) / jnp.sqrt(c_in)
    w2 = jax.random.uniform(k2, (c_in, c_hid), jnp.float32, -1.0, 1.0) / jnp.sqrt(c_hid)

    # Reference (matches PyTorch forward).
    ref = jnp.maximum(jnp.maximum(x @ w1.T, 0.0) @ w2.T, 0.0)

    # f32 path: exact check, including non-divisible batch (partial last block).
    out = jax.block_until_ready(adapter_forward(x, w1, w2))
    assert out.shape == (batch, c_in) and out.dtype == jnp.float32
    assert jnp.allclose(out, ref, atol=1e-5, rtol=1e-5)

    # bf16 MXU path: the recommended fast path on v5e/v6e/v7x.
    out_bf16 = jax.block_until_ready(
        adapter_forward(x, w1, w2, compute_dtype=jnp.bfloat16))
    assert out_bf16.shape == (batch, c_in) and out_bf16.dtype == jnp.bfloat16
    assert jnp.allclose(out_bf16.astype(jnp.float32), ref, atol=5e-2, rtol=5e-2)

    print("KERNEL_OK")
</pallas_src>

<mosaic_0001>
module attributes {stable_mosaic.version = 11 : i64} {
  func.func @adapter_kernel(%arg0: i32, %arg1: memref<160x256xf32, #tpu.memory_space<vmem>>, %arg2: memref<256x64xf32, #tpu.memory_space<vmem>>, %arg3: memref<64x256xf32, #tpu.memory_space<vmem>>, %arg4: memref<160x256xf32, #tpu.memory_space<vmem>>) attributes {dimension_semantics = [#tpu.dimension_semantics<parallel>], iteration_bounds = array<i64: 2>, scalar_prefetch = 0 : i64, scratch_operands = 0 : i64, tpu.core_type = #tpu.core_type<tc>, window_params = [{transform_indices = @transform_0, window_bounds = array<i64: 160, 256>}, {pipeline_mode = #tpu.pipeline_mode<synchronous>, transform_indices = @transform_1, window_bounds = array<i64: 256, 64>}, {pipeline_mode = #tpu.pipeline_mode<synchronous>, transform_indices = @transform_2, window_bounds = array<i64: 64, 256>}, {transform_indices = @transform_3, window_bounds = array<i64: 160, 256>}]} {
    %c0 = arith.constant 0 : index
    %c0_0 = arith.constant 0 : index
    %0 = vector.load %arg1[%c0, %c0_0] : memref<160x256xf32, #tpu.memory_space<vmem>>, vector<160x256xf32>
    %c0_1 = arith.constant 0 : index
    %c0_2 = arith.constant 0 : index
    %1 = vector.load %arg2[%c0_1, %c0_2] : memref<256x64xf32, #tpu.memory_space<vmem>>, vector<256x64xf32>
    %cst = arith.constant dense<0.000000e+00> : vector<160x64xf32>
    %2 = tpu.matmul %0, %1, %cst {dimension_numbers = #tpu.dot_dimension_numbers<[1], [0], [0], [1], [0, 0, 1, 1], [], []>} : vector<160x256xf32>, vector<256x64xf32>, vector<160x64xf32> -> vector<160x64xf32>
    %cst_3 = arith.constant 0.000000e+00 : f32
    %3 = vector.broadcast %cst_3 : f32 to vector<160x64xf32>
    %4 = arith.maximumf %2, %3 : vector<160x64xf32>
    %c0_4 = arith.constant 0 : index
    %c0_5 = arith.constant 0 : index
    %5 = vector.load %arg3[%c0_4, %c0_5] : memref<64x256xf32, #tpu.memory_space<vmem>>, vector<64x256xf32>
    %cst_6 = arith.constant dense<0.000000e+00> : vector<160x256xf32>
    %6 = tpu.matmul %4, %5, %cst_6 {dimension_numbers = #tpu.dot_dimension_numbers<[1], [0], [0], [1], [0, 0, 1, 1], [], []>} : vector<160x64xf32>, vector<64x256xf32>, vector<160x256xf32> -> vector<160x256xf32>
    %cst_7 = arith.constant 0.000000e+00 : f32
    %7 = vector.broadcast %cst_7 : f32 to vector<160x256xf32>
    %8 = arith.maximumf %6, %7 : vector<160x256xf32>
    %c0_8 = arith.constant 0 : index
    %c0_9 = arith.constant 0 : index
    %9 = vector.load %arg4[%c0_8, %c0_9] : memref<160x256xf32, #tpu.memory_space<vmem>>, vector<160x256xf32>
    tpu.vector_store %arg4[%c0_8, %c0_9], %8 {strides = array<i32>} : memref<160x256xf32, #tpu.memory_space<vmem>>, vector<160x256xf32>,
    return
  }
  func.func @transform_0(%arg0: i32) -> (i32, i32) {
    %c0_i32 = arith.constant 0 : i32
    %c0_i32_0 = arith.constant 0 : i32
    return %arg0, %c0_i32 : i32, i32
  }
  func.func @transform_1(%arg0: i32) -> (i32, i32) {
    %c0_i32 = arith.constant 0 : i32
    %c0_i32_0 = arith.constant 0 : i32
    %c0_i32_1 = arith.constant 0 : i32
    return %c0_i32, %c0_i32_0 : i32, i32
  }
  func.func @transform_2(%arg0: i32) -> (i32, i32) {
    %c0_i32 = arith.constant 0 : i32
    %c0_i32_0 = arith.constant 0 : i32
    %c0_i32_1 = arith.constant 0 : i32
    return %c0_i32, %c0_i32_0 : i32, i32
  }
  func.func @transform_3(%arg0: i32) -> (i32, i32) {
    %c0_i32 = arith.constant 0 : i32
    %c0_i32_0 = arith.constant 0 : i32
    return %arg0, %c0_i32 : i32, i32
  }
}

</mosaic_0001>

<bundles_post_ra>
// kernel: tpu_custom_call.1
= control target key start
LH: loop header
LB: loop body
LE: loop exit
PB: predicated region body
PF: predicated region fallthrough
CT: control target
= control target key end

     0   :  { %8 = vsyncpa [#allocation3], 0  ;;  %s1589_s0 = inlined_call_operand.hbm [shape: f32[300,256], index: 0, kind: input, shape index: {}]   ;;  %s1590_s1 = inlined_call_operand.vmem [shape: f32[256,64], index: 1, kind: input, shape index: {}]   ;;  %s1591_s2 = inlined_call_operand.vmem [shape: f32[64,256], index: 2, kind: input, shape index: {}]   ;;  %s1592_s3 = inlined_call_operand.hbm [shape: f32[300,256], index: 3, kind: output, shape index: {}]  }
   0x1   :  { %10 = vsyncpa [#allocation3 + $0x1], 0 }
   0x2   :  { %11 = vsyncpa [#allocation4], 0 }
   0x3   :  { %13 = vsyncpa [#allocation4 + $0x1], 0  ;;  %s1116_s12 = smov 0   ;;  %s1118_s13 = smov 0  }
   0x4   :  { %s1120_s14 = smov 0   ;;  %s1122_s15 = smov 0  }
   0x5 LB: > { %s1137_s16 = sadd.s32 4294967295, %s1087_s15   ;;  %s903_s17 = sadd.s32 4294967294, %s1087_s15   ;;  %s1087_s15 = sphi %s1122_s15, %s1602_s15   ;;  %s1083_s14 = sphi %s1120_s14, %s1601_s14   ;;  %s1079_s13 = sphi %s1118_s13, %s1600_s13   ;;  %s1075_s12 = sphi %s1116_s12, %s1599_s12  }
   0x6   : > { %s1141_s18 = sadd.s32 1, %s1087_s15   ;;  %s26_s19 = sadd.s32 1, %s1083_s14 }
   0x7   : > { %s23_s20 = ssub.s32 %s1087_s15, %s1141_s18  ;;  %p33_p0 = scmp.ne.s32.totalorder %s1083_s14, %s1079_s13 }
   0x8   : > { %p24_p1 = scmp.eq.s32.totalorder %s23_s20, 0  ;;  %p34_p2 = scmp.eq.s32.totalorder %s1087_s15, 0 }
   0x9   : > { %p39_p3 = scmp.ne.s32.totalorder %s1079_s13, %s1075_s12  ;;  %p40_p4 = scmp.eq.s32.totalorder %s1137_s16, 0 }
   0xa   : > { %s1153_s21 = scalar_select %p24_p1, %s1083_s14, %s26_s19  }
   0xb   : > { %p35_p5 = por %p34_p2, %p33_p0  ;;  %p1155_p6 = por %p40_p4, %p39_p3 }
   0xc   : > { %p105_p7 = scmp.eq.s32.totalorder %s1137_s16, 1  ;;  %p111_p8 = scmp.eq.s32.totalorder %s903_s17, 1 }
   0xd   : > { %p1593_p11 = scmp.ge.s32.totalorder %s1087_s15, 2 }
   0xe   : > { %p1160_p9 = por %p105_p7, %p33_p0  ;;  %p1164_p10 = por %p111_p8, %p39_p3 }
   0xf   : > { %133 = sbr.rel (%p1593_p11) target bundleno = 54 (0x36), region = 24 }
  0x10   : > { %s1596_s24 = scalar_select %p1164_p10, 1, 0 }
  0x14   : > { %136 = sbr.rel (!%p35_p5) target bundleno = 54 (0x36), region = 28  ;;  %s137_s25 = sand.u32 (%p35_p5), 1, %s1083_s14  }
  0x15   : > { %s142_s26 = smul.u32 (%p35_p5), 20, %s1087_s15  ;;  %s1176_s4 = scalar_lea.sflag (%p35_p5), [#allocation3], %s137_s25 }
  0x16   : > { %s951_s27 = smul.u32 (%p35_p5), 320, %s137_s25 }
  0x17   : > { %s143_s28 = ssub.s32 (%p35_p5), 38, %s142_s26 }
  0x18   : > { %p144_p12 = scmp.lt.s32.totalorder (%p35_p5), %s143_s28, 20  ;;  %s141_s5 = scalar_lea.vmem (%p35_p5), [#allocation2], %s951_s27 }
  0x1a   : > { %s1604_s28 = smov (!%p144_p12, %s143_s28), 20 }
  0x1b   : > { %s1173_s29 = sshll.u32 %s1604_s28, 8 }
  0x1c   : > { %s149_s30 = ssub.s32 5120, %s1173_s29 }
  0x1d   : > { %150 = vsyncadd %s1176_s4, %s149_s30  ;;  %p908_p13 = scmp.ne.s32.totalorder %s1173_s29, 0  ;;  %s949_s6 = smul.u32 5120, %s1087_s15 }
  0x1e   : > { %s156_s7 = sshll.u32 %s141_s5, 4  ;;  %s1001_s20 = scalar_lea.hbm %s1589_s0, 9728  ;;  %s1186_s7 = int_to_ptr.vmem [resolvable:$true] %s156_s7 }
  0x1f   : > { %s1184_s10 = scalar_lea.hbm %s1589_s0, %s949_s6 }
  0x20   : > { %s997_s11 = scalar_lea.hbm %s1184_s10, %s1173_s29  ;;  %p1002_p3 = scmp.lt.s32.totalorder %s1184_s10, %s1589_s0 }
  0x21   : > { %p998_p0 = scmp.ne.s32.totalorder %s1184_s10, %s997_s11  ;;  %p1003_p4 = scmp.lt.s32.totalorder %s1001_s20, %s997_s11 }
  0x23   : > { %p999_p1 = pnand %p998_p0, %p908_p13  ;;  %p1004_p5 = por %p1003_p4, %p1002_p3 }
  0x25   : > { %p1000_p2 = pneg %p999_p1 }
  0x27   : > { %p1005_p7 = pnand %p1004_p5, %p1000_p2 }
  0x29   : > { %1008 = shalt.err (!%p1005_p7)
}
  0x2a   : > { %s1009_s27 = scalar_lea.vmem %s1186_s7, %s1173_s29  ;;  %s1089_s28 = smov [#allocation2]  }
  0x2b   : > { %p1010_p8 = scmp.ne.s32.totalorder %s1186_s7, %s1009_s27  ;;  %s1013_s30 = sshll.u32 %s1089_s28, 4  ;;  %s1014_s30 = int_to_ptr.vmem [resolvable:$false] %s1013_s30 }
  0x2c   : > { %s1015_s5 = scalar_lea.vmem %s1014_s30, 10240  ;;  %p1016_p1 = scmp.lt.s32.totalorder %s1186_s7, %s1014_s30 }
  0x2d   : > { %p1011_p12 = pnand %p1010_p8, %p908_p13  ;;  %p1017_p11 = scmp.lt.s32.totalorder %s1015_s5, %s1009_s27 }
  0x2f   : > { %p1012_p0 = pneg %p1011_p12  ;;  %p1018_p10 = por %p1017_p11, %p1016_p1 }
  0x31   : > { %p1019_p3 = pnand %p1018_p10, %p1012_p0 }
  0x33   : > { %1022 = shalt.err (!%p1019_p3)
}
  0x34   : > { %s1090_s6 = smov 256   ;;  %s1091_s8 = smov 16  }
  0x35   : > { %162 = dma.hbm_to_vmem [thread:$0]  (%p908_p13), %s1184_s10, %s1173_s29, %s1186_s7, %s1176_s4, %s1090_s6, %s1090_s6, %s1091_s8  }
  0x36 PF: > { %p913_p2 = scmp.ge.s32.totalorder %s1087_s15, 1  ;;  %p164_p4 = scmp.lt.s32.totalorder %s1087_s15, 3 }
  0x38   : > { %p165_p5 = pnand %p913_p2, %p164_p4 }
  0x39   : > { %s1215_s9 = sand.u32 (!%p165_p5), 1, %s1079_s13  }
  0x3a   : > { %168 = sbr.rel (%p165_p5) target bundleno = 625 (0x271), region = 32  ;;  %s171_s17 = scalar_lea.sflag (!%p165_p5), [#allocation3], %s1215_s9 }
  0x3b   : > { %s952_s11 = smul.u32 (!%p165_p5), 320, %s1215_s9 }
  0x3d   : > { %s1221_s19 = scalar_lea.vmem (!%p165_p5), [#allocation2], %s952_s11 }
  0x3f   : > { %1066 = dma.done.wait (%p1155_p6), %s171_s17, 5120  }
  0x40   : > { %1068 = vsyncadd (%p1155_p6), %s171_s17, 4294962176  ;;  %v1092_v0 = vmov 0.0   ;;  %v264_v1 = vld [vmem:[%s1590_s1 + $0x78] sm:$0xff]  ;;  %v263_v2 = vld [vmem:[%s1590_s1 + $0x70] sm:$0xff]  ;;  %vm482_vm0 = vcmask 523264   ;;  %s816_s25 = smul.u32 (%p1160_p9), 20, %s1137_s16 }
  0x41   : > { %281 = vmatprep.subr.mxu0 %v1092_v0  ;;  %607 = vmatprep.mubr.f32.mxu1 %v1092_v0  ;;  %v262_v3 = vld [vmem:[%s1590_s1 + $0x68] sm:$0xff]  ;;  %v261_v4 = vld [vmem:[%s1590_s1 + $0x60] sm:$0xff]  ;;  %v260_v5 = vld [vmem:[%s1590_s1 + $0x58] sm:$0xff] }
  0x42   : > { %282 = vmatpush1.msra.mxu0 %v264_v1  ;;  %v259_v6 = vld [vmem:[%s1590_s1 + $0x50] sm:$0xff]  ;;  %v258_v7 = vld [vmem:[%s1590_s1 + $0x48] sm:$0xff]  ;;  %v257_v9 = vld [vmem:[%s1590_s1 + $0x40] sm:$0xff]  ;;  %s817_s26 = ssub.s32 (%p1160_p9), 38, %s816_s25 }
  0x43   : > { %283 = vmatprep.subr.mxu0 %v1092_v0  ;;  %v210_v8 = vld [vmem:[%s1221_s19 + $0x8] sm:$0xff]  ;;  %v256_v10 = vld [vmem:[%s1590_s1 + $0x38] sm:$0xff]  ;;  %v255_v11 = vld [vmem:[%s1590_s1 + $0x30] sm:$0xff]  ;;  %p818_p6 = scmp.lt.s32.totalorder (%p1160_p9), %s817_s26, 20 }
  0x44   : > { %284 = vmatpush1.msra.mxu0 %v263_v2  ;;  %345 = vmatprep.mubr.f32.mxu0 %v210_v8  ;;  %v254_v12 = vld [vmem:[%s1590_s1 + $0x28] sm:$0xff]  ;;  %v253_v13 = vld [vmem:[%s1590_s1 + $0x20] sm:$0xff]  ;;  %v252_v14 = vld [vmem:[%s1590_s1 + $0x18] sm:$0xff] }
  0x45   : > { %285 = vmatprep.subr.mxu0 %v1092_v0  ;;  %v251_v15 = vld [vmem:[%s1590_s1 + $0x10] sm:$0xff]  ;;  %v481_v16 = vld [vmem:[%s1591_s2 + $0x78] sm:$0xff]  ;;  %v479_v18 = vld [vmem:[%s1591_s2 + $0x68] sm:$0xff] }
  0x46   : > { %286 = vmatpush1.msra.mxu0 %v262_v3  ;;  %v480_v17 = vld [vmem:[%s1591_s2 + $0x70] sm:$0xff]  ;;  %559 = vmatprep.subr.mxu1 %v481_v16  ;;  %v478_v19 = vld [vmem:[%s1591_s2 + $0x60] sm:$0xff]  ;;  %v250_v20 = vld [vmem:[%s1590_s1 + $0x8] sm:$0xff] }
  0x47   : > { %287 = vmatprep.subr.mxu0 %v1092_v0  ;;  %560 = vmatpush1.msra.mxu1 %v480_v17  ;;  %v477_v21 = vld [vmem:[%s1591_s2 + $0x58] sm:$0xff]  ;;  %v476_v22 = vld [vmem:[%s1591_s2 + $0x50] sm:$0xff]  ;;  %v249_v23 = vld [vmem:[%s1590_s1] sm:$0xff] }
  0x48   : > { %288 = vmatpush1.msra.mxu0 %v261_v4  ;;  %561 = vmatprep.subr.mxu1 %v479_v18  ;;  %v475_v24 = vld [vmem:[%s1591_s2 + $0x48] sm:$0xff]  ;;  %v474_v25 = vld [vmem:[%s1591_s2 + $0x40] sm:$0xff]  ;;  %v280_v26 = vld [vmem:[%s1590_s1 + $0xf8] sm:$0xff] }
  0x49   : > { %289 = vmatprep.subr.mxu0 %v1092_v0  ;;  %562 = vmatpush1.msra.mxu1 %v478_v19  ;;  %v473_v27 = vld [vmem:[%s1591_s2 + $0x38] sm:$0xff]  ;;  %v472_v28 = vld [vmem:[%s1591_s2 + $0x30] sm:$0xff]  ;;  %v471_v30 = vld [vmem:[%s1591_s2 + $0x28] sm:$0xff] }
  0x4a   : > { %290 = vmatpush1.msra.mxu0 %v260_v5  ;;  %563 = vmatprep.subr.mxu1 %v477_v21  ;;  %v279_v29 = vld [vmem:[%s1590_s1 + $0xf0] sm:$0xff]  ;;  %v470_v31 = vld [vmem:[%s1591_s2 + $0x20] sm:$0xff]  ;;  %v278_v32 = vld [vmem:[%s1590_s1 + $0xe8] sm:$0xff] }
  0x4b   : > { %291 = vmatprep.subr.mxu0 %v1092_v0  ;;  %564 = vmatpush1.msra.mxu1 %v476_v22  ;;  %v469_v33 = vld [vmem:[%s1591_s2 + $0x18] sm:$0xff]  ;;  %v277_v34 = vld [vmem:[%s1590_s1 + $0xe0] sm:$0xff]  ;;  %v275_v36 = vld [vmem:[%s1590_s1 + $0xd0] sm:$0xff] }
  0x4c   : > { %292 = vmatpush1.msra.mxu0 %v259_v6  ;;  %565 = vmatprep.subr.mxu1 %v475_v24  ;;  %v276_v35 = vld [vmem:[%s1590_s1 + $0xd8] sm:$0xff]  ;;  %v274_v37 = vld [vmem:[%s1590_s1 + $0xc8] sm:$0xff]  ;;  %v273_v38 = vld [vmem:[%s1590_s1 + $0xc0] sm:$0xff] }
  0x4d   : > { %293 = vmatprep.subr.mxu0 %v1092_v0  ;;  %566 = vmatpush1.msra.mxu1 %v474_v25  ;;  %v272_v39 = vld [vmem:[%s1590_s1 + $0xb8] sm:$0xff]  ;;  %v271_v40 = vld [vmem:[%s1590_s1 + $0xb0] sm:$0xff]  ;;  %v270_v41 = vld [vmem:[%s1590_s1 + $0xa8] sm:$0xff] }
  0x4e   : > { %294 = vmatpush1.msra.mxu0 %v258_v7  ;;  %567 = vmatprep.subr.mxu1 %v473_v27  ;;  %v269_v42 = vld [vmem:[%s1590_s1 + $0xa0] sm:$0xff]  ;;  %v268_v43 = vld [vmem:[%s1590_s1 + $0x98] sm:$0xff]  ;;  %v267_v44 = vld [vmem:[%s1590_s1 + $0x90] sm:$0xff] }
  0x4f   : > { %295 = vmatprep.subr.mxu0 %v1092_v0  ;;  %568 = vmatpush1.msra.mxu1 %v472_v28  ;;  %v266_v45 = vld [vmem:[%s1590_s1 + $0x88] sm:$0xff]  ;;  %v265_v46 = vld [vmem:[%s1590_s1 + $0x80] sm:$0xff]  ;;  %v212_v48 = vld [vmem:[%s1221_s19 + $0x18] sm:$0xff] }
  0x50   : > { %296 = vmatpush1.msra.mxu0 %v257_v9  ;;  %569 = vmatprep.subr.mxu1 %v471_v30  ;;  %v209_v47 = vld [vmem:[%s1221_s19] sm:$0xff]  ;;  %v211_v49 = vld [vmem:[%s1221_s19 + $0x10] sm:$0xff]  ;;  %v214_v50 = vld [vmem:[%s1221_s19 + $0x28] sm:$0xff] }
  0x51   : > { %297 = vmatprep.subr.mxu0 %v1092_v0  ;;  %570 = vmatpush1.msra.mxu1 %v470_v31  ;;  %v213_v51 = vld [vmem:[%s1221_s19 + $0x20] sm:$0xff]  ;;  %v216_v52 = vld [vmem:[%s1221_s19 + $0x38] sm:$0xff]  ;;  %v215_v53 = vld [vmem:[%s1221_s19 + $0x30] sm:$0xff] }
  0x52   : > { %298 = vmatpush1.msra.mxu0 %v256_v10  ;;  %571 = vmatprep.subr.mxu1 %v469_v33  ;;  %v218_v54 = vld [vmem:[%s1221_s19 + $0x48] sm:$0xff]  ;;  %v217_v55 = vld [vmem:[%s1221_s19 + $0x40] sm:$0xff]  ;;  %v220_v56 = vld [vmem:[%s1221_s19 + $0x58] sm:$0xff] }
  0x53   : > { %299 = vmatprep.subr.mxu0 %v1092_v0  ;;  %v219_v57 = vld [vmem:[%s1221_s19 + $0x50] sm:$0xff]  ;;  %v222_v58 = vld [vmem:[%s1221_s19 + $0x68] sm:$0xff]  ;;  %v221_v59 = vld [vmem:[%s1221_s19 + $0x60] sm:$0xff] }
  0x54   : > { %300 = vmatpush1.msra.mxu0 %v255_v11  ;;  %v224_v60 = vld [vmem:[%s1221_s19 + $0x78] sm:$0xff]  ;;  %v223_v61 = vld [vmem:[%s1221_s19 + $0x70] sm:$0xff]  ;;  %v226_v62 = vld [vmem:[%s1221_s19 + $0x88] sm:$0xff] }
  0x55   : > { %301 = vmatprep.subr.mxu0 %v1092_v0  ;;  %v225_v63 = vld [vmem:[%s1221_s19 + $0x80] sm:$0xff]  ;;  %v228_v1 = vld [vmem:[%s1221_s19 + $0x98] sm:$0xff]  ;;  %v227_v2 = vld [vmem:[%s1221_s19 + $0x90] sm:$0xff] }
  0x56   : > { %302 = vmatpush1.msra.mxu0 %v254_v12  ;;  %v230_v3 = vld [vmem:[%s1221_s19 + $0xa8] sm:$0xff]  ;;  %v229_v4 = vld [vmem:[%s1221_s19 + $0xa0] sm:$0xff]  ;;  %v232_v5 = vld [vmem:[%s1221_s19 + $0xb8] sm:$0xff] }
  0x57   : > { %303 = vmatprep.subr.mxu0 %v1092_v0  ;;  %v231_v6 = vld [vmem:[%s1221_s19 + $0xb0] sm:$0xff]  ;;  %v234_v7 = vld [vmem:[%s1221_s19 + $0xc8] sm:$0xff]  ;;  %v233_v8 = vld [vmem:[%s1221_s19 + $0xc0] sm:$0xff] }
  0x58   : > { %304 = vmatpush1.msra.mxu0 %v253_v13  ;;  %v236_v9 = vld [vmem:[%s1221_s19 + $0xd8] sm:$0xff]  ;;  %v235_v10 = vld [vmem:[%s1221_s19 + $0xd0] sm:$0xff]  ;;  %v238_v11 = vld [vmem:[%s1221_s19 + $0xe8] sm:$0xff] }
  0x59   : > { %305 = vmatprep.subr.mxu0 %v1092_v0  ;;  %v237_v12 = vld [vmem:[%s1221_s19 + $0xe0] sm:$0xff]  ;;  %v240_v13 = vld [vmem:[%s1221_s19 + $0xf8] sm:$0xff]  ;;  %v468_v18 = vld [vmem:[%s1591_s2 + $0x10] sm:$0xff] }
  0x5a   : > { %306 = vmatpush1.msra.mxu0 %v252_v14  ;;  %v239_v14 = vld [vmem:[%s1221_s19 + $0xf0] sm:$0xff]  ;;  %v241_v16 = vld [vmem:[%s1221_s19 + $0x100] sm:$0xff]  ;;  %v244_v17 = vld [vmem:[%s1221_s19 + $0x118] sm:$0xff]  ;;  %572 = vmatpush1.msra.mxu1 %v468_v18 }
  0x5b   : > { %307 = vmatprep.subr.mxu0 %v1092_v0  ;;  %v467_v19 = vld [vmem:[%s1591_s2 + $0x8] sm:$0xff]  ;;  %v466_v21 = vld [vmem:[%s1591_s2] sm:$0xff]  ;;  %v248_v24 = vld [vmem:[%s1221_s19 + $0x138] sm:$0xff] }
  0x5c   : > { %308 = vmatpush1.msra.mxu0 %v251_v15  ;;  %v242_v15 = vld [vmem:[%s1221_s19 + $0x108] sm:$0xff]  ;;  %573 = vmatprep.subr.mxu1 %v467_v19  ;;  %v247_v25 = vld [vmem:[%s1221_s19 + $0x130] sm:$0xff] }
  0x5d   : > { %309 = vmatprep.subr.mxu0 %v1092_v0  ;;  %v246_v22 = vld [vmem:[%s1221_s19 + $0x128] sm:$0xff]  ;;  %574 = vmatpush1.msra.mxu1 %v466_v21 }
  0x5e   : > { %310 = vmatpush1.msra.mxu0 %v250_v20  ;;  %v243_v20 = vld [vmem:[%s1221_s19 + $0x110] sm:$0xff] }
  0x5f   : > { %311 = vmatprep.subr.mxu0 %v1092_v0 }
  0x60   : > { %312 = vmatpush1.msra.mxu0 %v249_v23  ;;  %v245_v23 = vld [vmem:[%s1221_s19 + $0x120] sm:$0xff]  ;;  %s1485_s19 = scalar_lea.vmem [#allocation5], %s952_s11  ;;  %s809_s11 = scalar_lea.sflag [#allocation4], %s1215_s9 }
  0x61   : > { %313 = vmatprep.subr.mxu0 %v1092_v0 }
  0x62   : > { %314 = vmatpush2.msra.mxu0 %v280_v26 }
  0x63   : > { %315 = vmatprep.subr.mxu0 %v1092_v0 }
  0x64   : > { %316 = vmatpush2.msra.mxu0 %v279_v29 }
  0x65   : > { %317 = vmatprep.subr.mxu0 %v1092_v0 }
  0x66   : > { %318 = vmatpush2.msra.mxu0 %v278_v32 }
  0x67   : > { %319 = vmatprep.subr.mxu0 %v1092_v0 }
  0x68   : > { %320 = vmatpush2.msra.mxu0 %v277_v34 }
  0x69   : > { %321 = vmatprep.subr.mxu0 %v1092_v0 }
  0x6a   : > { %322 = vmatpush2.msra.mxu0 %v276_v35 }
  0x6b   : > { %323 = vmatprep.subr.mxu0 %v1092_v0 }
  0x6c   : > { %324 = vmatpush2.msra.mxu0 %v275_v36 }
  0x6d   : > { %325 = vmatprep.subr.mxu0 %v1092_v0 }
  0x6e   : > { %326 = vmatpush2.msra.mxu0 %v274_v37 }
  0x6f   : > { %327 = vmatprep.subr.mxu0 %v1092_v0 }
  0x70   : > { %328 = vmatpush2.msra.mxu0 %v273_v38 }
  0x71   : > { %329 = vmatprep.subr.mxu0 %v1092_v0 }
  0x72   : > { %330 = vmatpush2.msra.mxu0 %v272_v39 }
  0x73   : > { %331 = vmatprep.subr.mxu0 %v1092_v0 }
  0x74   : > { %332 = vmatpush2.msra.mxu0 %v271_v40 }
  0x75   : > { %333 = vmatprep.subr.mxu0 %v1092_v0 }
  0x76   : > { %334 = vmatpush2.msra.mxu0 %v270_v41 }
  0x77   : > { %335 = vmatprep.subr.mxu0 %v1092_v0 }
  0x78   : > { %336 = vmatpush2.msra.mxu0 %v269_v42 }
  0x79   : > { %337 = vmatprep.subr.mxu0 %v1092_v0 }
  0x7a   : > { %338 = vmatpush2.msra.mxu0 %v268_v43 }
  0x7b   : > { %339 = vmatprep.subr.mxu0 %v1092_v0 }
  0x7c   : > { %340 = vmatpush2.msra.mxu0 %v267_v44 }
  0x7d   : > { %341 = vmatprep.subr.mxu0 %v1092_v0 }
  0x7e   : > { %342 = vmatpush2.msra.mxu0 %v266_v45 }
  0x7f   : > { %343 = vmatprep.subr.mxu0 %v1092_v0 }
  0x80   : > { %344 = vmatpush2.msra.mxu0 %v265_v46 }
  0x81   : > { %346 = vmatmul.mubr.f32.vlgmr.msra.gmra.mxu0 %v209_v47 }
  0x82   : > { %350 = vmatprep.mubr.f32.mxu0 %v212_v48 }
  0x85   : > { %351 = vmatmul.mubr.f32.gmra.mxu0 %v211_v49 }
  0x86   : > { %355 = vmatprep.mubr.f32.mxu0 %v214_v50 }
  0x89   : > { %356 = vmatmul.mubr.f32.gmra.mxu0 %v213_v51 }
  0x8a   : > { %360 = vmatprep.mubr.f32.mxu0 %v216_v52 }
  0x8d   : > { %361 = vmatmul.mubr.f32.gmra.mxu0 %v215_v53 }
  0x8e   : > { %365 = vmatprep.mubr.f32.mxu0 %v218_v54 }
  0x91   : > { %366 = vmatmul.mubr.f32.gmra.mxu0 %v217_v55 }
  0x92   : > { %370 = vmatprep.mubr.f32.mxu0 %v220_v56 }
  0x95   : > { %371 = vmatmul.mubr.f32.gmra.mxu0 %v219_v57 }
  0x96   : > { %375 = vmatprep.mubr.f32.mxu0 %v222_v58 }
  0x99   : > { %376 = vmatmul.mubr.f32.gmra.mxu0 %v221_v59 }
  0x9a   : > { %380 = vmatprep.mubr.f32.mxu0 %v224_v60 }
  0x9d   : > { %381 = vmatmul.mubr.f32.gmra.mxu0 %v223_v61 }
  0x9e   : > { %385 = vmatprep.mubr.f32.mxu0 %v226_v62 }
  0xa1   : > { %386 = vmatmul.mubr.f32.gmra.mxu0 %v225_v63 }
  0xa2   : > { %390 = vmatprep.mubr.f32.mxu0 %v228_v1 }
  0xa5   : > { %391 = vmatmul.mubr.f32.gmra.mxu0 %v227_v2 }
  0xa6   : > { %395 = vmatprep.mubr.f32.mxu0 %v230_v3 }
  0xa9   : > { %396 = vmatmul.mubr.f32.gmra.mxu0 %v229_v4 }
  0xaa   : > { %400 = vmatprep.mubr.f32.mxu0 %v232_v5 }
  0xad   : > { %401 = vmatmul.mubr.f32.gmra.mxu0 %v231_v6 }
  0xae   : > { %405 = vmatprep.mubr.f32.mxu0 %v234_v7 }
  0xb1   : > { %406 = vmatmul.mubr.f32.gmra.mxu0 %v233_v8 }
  0xb2   : > { %410 = vmatprep.mubr.f32.mxu0 %v236_v9 }
  0xb5   : > { %411 = vmatmul.mubr.f32.gmra.mxu0 %v235_v10 }
  0xb6   : > { %415 = vmatprep.mubr.f32.mxu0 %v238_v11 }
  0xb9   : > { %416 = vmatmul.mubr.f32.gmra.mxu0 %v237_v12 }
  0xba   : > { %420 = vmatprep.mubr.f32.mxu0 %v240_v13 }
  0xbd   : > { %421 = vmatmul.mubr.f32.gmra.mxu0 %v239_v14 }
  0xbe   : > { %425 = vmatprep.mubr.f32.mxu0 %v242_v15 }
  0xc1   : > { %426 = vmatmul.mubr.f32.gmra.mxu0 %v241_v16 }
  0xc2   : > { %430 = vmatprep.mubr.f32.mxu0 %v244_v17 }
  0xc5   : > { %431 = vmatmul.mubr.f32.gmra.mxu0 %v243_v20 }
  0xc6   : > { %435 = vmatprep.mubr.f32.mxu0 %v246_v22 }
  0xc9   : > { %436 = vmatmul.mubr.f32.gmra.mxu0 %v245_v23 }
  0xca   : > { %440 = vmatprep.mubr.f32.mxu0 %v248_v24 }
  0xcd   : > { %441 = vmatmul.mubr.f32.gmra.mxu0 %v247_v25 }
 0x141   : > { %v347_v26 = vpop.f32.mrf.mxu0 }
 0x142   : > { %v446_v27 = vmax.f32 %v347_v26, 0.0 }
 0x143   : > { %v349_v28 = vpop.f32.mrf.mxu0 }
 0x144   : > { %914 = vmatmul.mubr.msk.f32.vlgmr.msra.gmra.mxu1 %vm482_vm0, %v446_v27 }
 0x145   : > { %v352_v29 = vpop.f32.mrf.mxu0  ;;  %613 = vmatprep.mubr.f32.mxu1 %v1092_v0 }
 0x146   : > { %v447_v30 = vmax.f32 %v352_v29, 0.0 }
 0x147   : > { %v354_v31 = vpop.f32.mrf.mxu0 }
 0x148   : > { %915 = vmatmul.mubr.msk.f32.gmra.mxu1 %vm482_vm0, %v447_v30 }
 0x149   : > { %v357_v32 = vpop.f32.mrf.mxu0  ;;  %619 = vmatprep.mubr.f32.mxu1 %v1092_v0 }
 0x14a   : > { %v448_v33 = vmax.f32 %v357_v32, 0.0 }
 0x14b   : > { %v359_v34 = vpop.f32.mrf.mxu0 }
 0x14c   : > { %916 = vmatmul.mubr.msk.f32.gmra.mxu1 %vm482_vm0, %v448_v33 }
 0x14d   : > { %v362_v35 = vpop.f32.mrf.mxu0  ;;  %625 = vmatprep.mubr.f32.mxu1 %v1092_v0 }
 0x14e   : > { %v449_v36 = vmax.f32 %v362_v35, 0.0 }
 0x14f   : > { %v364_v37 = vpop.f32.mrf.mxu0 }
 0x150   : > { %917 = vmatmul.mubr.msk.f32.gmra.mxu1 %vm482_vm0, %v449_v36 }
 0x151   : > { %v367_v38 = vpop.f32.mrf.mxu0  ;;  %631 = vmatprep.mubr.f32.mxu1 %v1092_v0 }
 0x152   : > { %v450_v39 = vmax.f32 %v367_v38, 0.0 }
 0x153   : > { %v369_v40 = vpop.f32.mrf.mxu0 }
 0x154   : > { %918 = vmatmul.mubr.msk.f32.gmra.mxu1 %vm482_vm0, %v450_v39 }
 0x155   : > { %v372_v41 = vpop.f32.mrf.mxu0  ;;  %637 = vmatprep.mubr.f32.mxu1 %v1092_v0 }
 0x156   : > { %v451_v42 = vmax.f32 %v372_v41, 0.0 }
 0x157   : > { %v374_v43 = vpop.f32.mrf.mxu0 }
 0x158   : > { %919 = vmatmul.mubr.msk.f32.gmra.mxu1 %vm482_vm0, %v451_v42 }
 0x159   : > { %v377_v44 = vpop.f32.mrf.mxu0  ;;  %643 = vmatprep.mubr.f32.mxu1 %v1092_v0 }
 0x15a   : > { %v452_v45 = vmax.f32 %v377_v44, 0.0 }
 0x15b   : > { %v379_v46 = vpop.f32.mrf.mxu0 }
 0x15c   : > { %920 = vmatmul.mubr.msk.f32.gmra.mxu1 %vm482_vm0, %v452_v45 }
 0x15d   : > { %v382_v47 = vpop.f32.mrf.mxu0  ;;  %649 = vmatprep.mubr.f32.mxu1 %v1092_v0 }
 0x15e   : > { %v453_v48 = vmax.f32 %v382_v47, 0.0 }
 0x15f   : > { %v384_v49 = vpop.f32.mrf.mxu0 }
 0x160   : > { %921 = vmatmul.mubr.msk.f32.gmra.mxu1 %vm482_vm0, %v453_v48 }
 0x161   : > { %v387_v50 = vpop.f32.mrf.mxu0  ;;  %655 = vmatprep.mubr.f32.mxu1 %v1092_v0 }
 0x162   : > { %v454_v51 = vmax.f32 %v387_v50, 0.0 }
 0x163   : > { %v389_v52 = vpop.f32.mrf.mxu0 }
 0x164   : > { %922 = vmatmul.mubr.msk.f32.gmra.mxu1 %vm482_vm0, %v454_v51 }
 0x165   : > { %v392_v53 = vpop.f32.mrf.mxu0  ;;  %661 = vmatprep.mubr.f32.mxu1 %v1092_v0 }
 0x166   : > { %v455_v54 = vmax.f32 %v392_v53, 0.0 }
 0x167   : > { %v394_v55 = vpop.f32.mrf.mxu0 }
 0x168   : > { %923 = vmatmul.mubr.msk.f32.gmra.mxu1 %vm482_vm0, %v455_v54 }
 0x169   : > { %v397_v56 = vpop.f32.mrf.mxu0  ;;  %667 = vmatprep.mubr.f32.mxu1 %v1092_v0 }
 0x16a   : > { %v456_v57 = vmax.f32 %v397_v56, 0.0 }
 0x16b   : > { %v399_v58 = vpop.f32.mrf.mxu0 }
 0x16c   : > { %924 = vmatmul.mubr.msk.f32.gmra.mxu1 %vm482_vm0, %v456_v57 }
 0x16d   : > { %v402_v59 = vpop.f32.mrf.mxu0  ;;  %673 = vmatprep.mubr.f32.mxu1 %v1092_v0 }
 0x16e   : > { %v457_v60 = vmax.f32 %v402_v59, 0.0 }
 0x16f   : > { %v404_v61 = vpop.f32.mrf.mxu0 }
 0x170   : > { %925 = vmatmul.mubr.msk.f32.gmra.mxu1 %vm482_vm0, %v457_v60 }
 0x171   : > { %v407_v62 = vpop.f32.mrf.mxu0  ;;  %679 = vmatprep.mubr.f32.mxu1 %v1092_v0 }
 0x172   : > { %v458_v63 = vmax.f32 %v407_v62, 0.0 }
 0x173   : > { %v409_v1 = vpop.f32.mrf.mxu0 }
 0x174   : > { %926 = vmatmul.mubr.msk.f32.gmra.mxu1 %vm482_vm0, %v458_v63 }
 0x175   : > { %v412_v2 = vpop.f32.mrf.mxu0  ;;  %685 = vmatprep.mubr.f32.mxu1 %v1092_v0 }
 0x176   : > { %v459_v3 = vmax.f32 %v412_v2, 0.0 }
 0x177   : > { %v414_v4 = vpop.f32.mrf.mxu0 }
 0x178   : > { %927 = vmatmul.mubr.msk.f32.gmra.mxu1 %vm482_vm0, %v459_v3 }
 0x179   : > { %v417_v5 = vpop.f32.mrf.mxu0  ;;  %691 = vmatprep.mubr.f32.mxu1 %v1092_v0 }
 0x17a   : > { %v460_v6 = vmax.f32 %v417_v5, 0.0 }
 0x17b   : > { %v419_v7 = vpop.f32.mrf.mxu0 }
 0x17c   : > { %928 = vmatmul.mubr.msk.f32.gmra.mxu1 %vm482_vm0, %v460_v6 }
 0x17d   : > { %v422_v8 = vpop.f32.mrf.mxu0  ;;  %697 = vmatprep.mubr.f32.mxu1 %v1092_v0 }
 0x17e   : > { %v461_v9 = vmax.f32 %v422_v8, 0.0 }
 0x17f   : > { %v424_v10 = vpop.f32.mrf.mxu0 }
 0x180   : > { %929 = vmatmul.mubr.msk.f32.gmra.mxu1 %vm482_vm0, %v461_v9 }
 0x181   : > { %v427_v11 = vpop.f32.mrf.mxu0  ;;  %703 = vmatprep.mubr.f32.mxu1 %v1092_v0 }
 0x182   : > { %v462_v12 = vmax.f32 %v427_v11, 0.0 }
 0x183   : > { %v429_v13 = vpop.f32.mrf.mxu0 }
 0x184   : > { %930 = vmatmul.mubr.msk.f32.gmra.mxu1 %vm482_vm0, %v462_v12 }
 0x185   : > { %v432_v14 = vpop.f32.mrf.mxu0  ;;  %709 = vmatprep.mubr.f32.mxu1 %v1092_v0 }
 0x186   : > { %v463_v15 = vmax.f32 %v432_v14, 0.0 }
 0x187   : > { %v434_v16 = vpop.f32.mrf.mxu0 }
 0x188   : > { %931 = vmatmul.mubr.msk.f32.gmra.mxu1 %vm482_vm0, %v463_v15 }
 0x189   : > { %v437_v17 = vpop.f32.mrf.mxu0  ;;  %715 = vmatprep.mubr.f32.mxu1 %v1092_v0 }
 0x18a   : > { %v464_v18 = vmax.f32 %v437_v17, 0.0 }
 0x18b   : > { %v439_v19 = vpop.f32.mrf.mxu0 }
 0x18c   : > { %932 = vmatmul.mubr.msk.f32.gmra.mxu1 %vm482_vm0, %v464_v18 }
 0x18d   : > { %v442_v20 = vpop.f32.mrf.mxu0  ;;  %721 = vmatprep.mubr.f32.mxu1 %v1092_v0 }
 0x18e   : > { %v465_v21 = vmax.f32 %v442_v20, 0.0 }
 0x18f   : > { %v444_v22 = vpop.f32.mrf.mxu0 }
 0x190   : > { %933 = vmatmul.mubr.msk.f32.gmra.mxu1 %vm482_vm0, %v465_v21 }
 0x204   : > { %v609_v23 = vpop.f32.mrf.mxu1 }
 0x205   : > { %v728_v24 = vmax.f32 %v609_v23, 0.0 }
 0x206   : > { %v611_v25 = vpop.f32.mrf.mxu1 }
 0x207   : > { %768 = vst [vmem:[%s1485_s19] sm:$0xff] %v728_v24  ;;  %v729_v26 = vmax.f32 %v611_v25, 0.0 }
 0x208   : > { %v615_v27 = vpop.f32.mrf.mxu1 }
 0x209   : > { %769 = vst [vmem:[%s1485_s19 + $0x8] sm:$0xff] %v729_v26  ;;  %v730_v0 = vmax.f32 %v615_v27, 0.0 }
 0x20a   : > { %v617_v28 = vpop.f32.mrf.mxu1 }
 0x20b   : > { %770 = vst [vmem:[%s1485_s19 + $0x10] sm:$0xff] %v730_v0  ;;  %v731_v29 = vmax.f32 %v617_v28, 0.0 }
 0x20c   : > { %v621_v30 = vpop.f32.mrf.mxu1 }
 0x20d   : > { %771 = vst [vmem:[%s1485_s19 + $0x18] sm:$0xff] %v731_v29  ;;  %v732_v31 = vmax.f32 %v621_v30, 0.0 }
 0x20e   : > { %v623_v32 = vpop.f32.mrf.mxu1 }
 0x20f   : > { %772 = vst [vmem:[%s1485_s19 + $0x20] sm:$0xff] %v732_v31  ;;  %v733_v33 = vmax.f32 %v623_v32, 0.0 }
 0x210   : > { %v627_v34 = vpop.f32.mrf.mxu1 }
 0x211   : > { %773 = vst [vmem:[%s1485_s19 + $0x28] sm:$0xff] %v733_v33  ;;  %v734_v35 = vmax.f32 %v627_v34, 0.0 }
 0x212   : > { %v629_v36 = vpop.f32.mrf.mxu1 }
 0x213   : > { %774 = vst [vmem:[%s1485_s19 + $0x30] sm:$0xff] %v734_v35  ;;  %v735_v37 = vmax.f32 %v629_v36, 0.0 }
 0x214   : > { %v633_v38 = vpop.f32.mrf.mxu1 }
 0x215   : > { %775 = vst [vmem:[%s1485_s19 + $0x38] sm:$0xff] %v735_v37  ;;  %v736_v39 = vmax.f32 %v633_v38, 0.0 }
 0x216   : > { %v635_v40 = vpop.f32.mrf.mxu1 }
 0x217   : > { %776 = vst [vmem:[%s1485_s19 + $0x40] sm:$0xff] %v736_v39  ;;  %v737_v41 = vmax.f32 %v635_v40, 0.0 }
 0x218   : > { %v639_v42 = vpop.f32.mrf.mxu1 }
 0x219   : > { %777 = vst [vmem:[%s1485_s19 + $0x48] sm:$0xff] %v737_v41  ;;  %v738_v43 = vmax.f32 %v639_v42, 0.0 }
 0x21a   : > { %v641_v44 = vpop.f32.mrf.mxu1 }
 0x21b   : > { %778 = vst [vmem:[%s1485_s19 + $0x50] sm:$0xff] %v738_v43  ;;  %v739_v45 = vmax.f32 %v641_v44, 0.0 }
 0x21c   : > { %v645_v46 = vpop.f32.mrf.mxu1 }
 0x21d   : > { %779 = vst [vmem:[%s1485_s19 + $0x58] sm:$0xff] %v739_v45  ;;  %v740_v47 = vmax.f32 %v645_v46, 0.0 }
 0x21e   : > { %v647_v48 = vpop.f32.mrf.mxu1 }
 0x21f   : > { %780 = vst [vmem:[%s1485_s19 + $0x60] sm:$0xff] %v740_v47  ;;  %v741_v49 = vmax.f32 %v647_v48, 0.0 }
 0x220   : > { %v651_v50 = vpop.f32.mrf.mxu1 }
 0x221   : > { %781 = vst [vmem:[%s1485_s19 + $0x68] sm:$0xff] %v741_v49  ;;  %v742_v51 = vmax.f32 %v651_v50, 0.0 }
 0x222   : > { %v653_v52 = vpop.f32.mrf.mxu1 }
 0x223   : > { %782 = vst [vmem:[%s1485_s19 + $0x70] sm:$0xff] %v742_v51  ;;  %v743_v53 = vmax.f32 %v653_v52, 0.0 }
 0x224   : > { %v657_v54 = vpop.f32.mrf.mxu1 }
 0x225   : > { %783 = vst [vmem:[%s1485_s19 + $0x78] sm:$0xff] %v743_v53  ;;  %v744_v55 = vmax.f32 %v657_v54, 0.0 }
 0x226   : > { %v659_v56 = vpop.f32.mrf.mxu1 }
 0x227   : > { %784 = vst [vmem:[%s1485_s19 + $0x80] sm:$0xff] %v744_v55  ;;  %v745_v57 = vmax.f32 %v659_v56, 0.0 }
 0x228   : > { %v663_v58 = vpop.f32.mrf.mxu1 }
 0x229   : > { %785 = vst [vmem:[%s1485_s19 + $0x88] sm:$0xff] %v745_v57  ;;  %v746_v59 = vmax.f32 %v663_v58, 0.0 }
 0x22a   : > { %v665_v60 = vpop.f32.mrf.mxu1 }
 0x22b   : > { %786 = vst [vmem:[%s1485_s19 + $0x90] sm:$0xff] %v746_v59  ;;  %v747_v61 = vmax.f32 %v665_v60, 0.0 }
 0x22c   : > { %v669_v62 = vpop.f32.mrf.mxu1 }
 0x22d   : > { %787 = vst [vmem:[%s1485_s19 + $0x98] sm:$0xff] %v747_v61  ;;  %v748_v63 = vmax.f32 %v669_v62, 0.0 }
 0x22e   : > { %v671_v1 = vpop.f32.mrf.mxu1 }
 0x22f   : > { %788 = vst [vmem:[%s1485_s19 + $0xa0] sm:$0xff] %v748_v63  ;;  %v749_v2 = vmax.f32 %v671_v1, 0.0 }
 0x230   : > { %v675_v3 = vpop.f32.mrf.mxu1 }
 0x231   : > { %789 = vst [vmem:[%s1485_s19 + $0xa8] sm:$0xff] %v749_v2  ;;  %v750_v4 = vmax.f32 %v675_v3, 0.0 }
 0x232   : > { %v677_v5 = vpop.f32.mrf.mxu1 }
 0x233   : > { %790 = vst [vmem:[%s1485_s19 + $0xb0] sm:$0xff] %v750_v4  ;;  %v751_v6 = vmax.f32 %v677_v5, 0.0 }
 0x234   : > { %v681_v7 = vpop.f32.mrf.mxu1 }
 0x235   : > { %791 = vst [vmem:[%s1485_s19 + $0xb8] sm:$0xff] %v751_v6  ;;  %v752_v8 = vmax.f32 %v681_v7, 0.0 }
 0x236   : > { %v683_v9 = vpop.f32.mrf.mxu1 }
 0x237   : > { %792 = vst [vmem:[%s1485_s19 + $0xc0] sm:$0xff] %v752_v8  ;;  %v753_v10 = vmax.f32 %v683_v9, 0.0 }
 0x238   : > { %v687_v11 = vpop.f32.mrf.mxu1 }
 0x239   : > { %793 = vst [vmem:[%s1485_s19 + $0xc8] sm:$0xff] %v753_v10  ;;  %v754_v12 = vmax.f32 %v687_v11, 0.0 }
 0x23a   : > { %v689_v13 = vpop.f32.mrf.mxu1 }
 0x23b   : > { %794 = vst [vmem:[%s1485_s19 + $0xd0] sm:$0xff] %v754_v12  ;;  %v755_v14 = vmax.f32 %v689_v13, 0.0 }
 0x23c   : > { %v693_v15 = vpop.f32.mrf.mxu1 }
 0x23d   : > { %795 = vst [vmem:[%s1485_s19 + $0xd8] sm:$0xff] %v755_v14  ;;  %v756_v16 = vmax.f32 %v693_v15, 0.0 }
 0x23e   : > { %v695_v17 = vpop.f32.mrf.mxu1 }
 0x23f   : > { %796 = vst [vmem:[%s1485_s19 + $0xe0] sm:$0xff] %v756_v16  ;;  %v757_v18 = vmax.f32 %v695_v17, 0.0 }
 0x240   : > { %v699_v19 = vpop.f32.mrf.mxu1 }
 0x241   : > { %797 = vst [vmem:[%s1485_s19 + $0xe8] sm:$0xff] %v757_v18  ;;  %v758_v20 = vmax.f32 %v699_v19, 0.0 }
 0x242   : > { %v701_v21 = vpop.f32.mrf.mxu1 }
 0x243   : > { %798 = vst [vmem:[%s1485_s19 + $0xf0] sm:$0xff] %v758_v20  ;;  %v759_v22 = vmax.f32 %v701_v21, 0.0 }
 0x244   : > { %v705_v23 = vpop.f32.mrf.mxu1 }
 0x245   : > { %799 = vst [vmem:[%s1485_s19 + $0xf8] sm:$0xff] %v759_v22  ;;  %v760_v24 = vmax.f32 %v705_v23, 0.0 }
 0x246   : > { %v707_v25 = vpop.f32.mrf.mxu1 }
 0x247   : > { %800 = vst [vmem:[%s1485_s19 + $0x100] sm:$0xff] %v760_v24  ;;  %v761_v26 = vmax.f32 %v707_v25, 0.0 }
 0x248   : > { %v711_v27 = vpop.f32.mrf.mxu1 }
 0x249   : > { %801 = vst [vmem:[%s1485_s19 + $0x108] sm:$0xff] %v761_v26  ;;  %v762_v0 = vmax.f32 %v711_v27, 0.0 }
 0x24a   : > { %v713_v28 = vpop.f32.mrf.mxu1 }
 0x24b   : > { %802 = vst [vmem:[%s1485_s19 + $0x110] sm:$0xff] %v762_v0  ;;  %v763_v29 = vmax.f32 %v713_v28, 0.0 }
 0x24c   : > { %v717_v30 = vpop.f32.mrf.mxu1 }
 0x24d   : > { %803 = vst [vmem:[%s1485_s19 + $0x118] sm:$0xff] %v763_v29  ;;  %v764_v31 = vmax.f32 %v717_v30, 0.0 }
 0x24e   : > { %v719_v32 = vpop.f32.mrf.mxu1 }
 0x24f   : > { %804 = vst [vmem:[%s1485_s19 + $0x120] sm:$0xff] %v764_v31  ;;  %v765_v33 = vmax.f32 %v719_v32, 0.0 }
 0x250   : > { %v723_v34 = vpop.f32.mrf.mxu1 }
 0x251   : > { %805 = vst [vmem:[%s1485_s19 + $0x128] sm:$0xff] %v765_v33  ;;  %v766_v35 = vmax.f32 %v723_v34, 0.0  ;;  %815 = sbr.rel (!%p1160_p9) target bundleno = 625 (0x271), region = 40 }
 0x252   : > { %v725_v36 = vpop.f32.mrf.mxu1 }
 0x253   : > { %806 = vst [vmem:[%s1485_s19 + $0x130] sm:$0xff] %v766_v35  ;;  %v767_v37 = vmax.f32 %v725_v36, 0.0 }
 0x255   : > { %807 = vst [vmem:[%s1485_s19 + $0x138] sm:$0xff] %v767_v37 }
 0x256   : > { %s1606_s26 = smov (!%p818_p6, %s817_s26), 20 }
 0x257   : > { %s1531_s27 = sshll.u32 %s1606_s26, 8 }
 0x258   : > { %s823_s28 = ssub.s32 5120, %s1531_s27 }
 0x259   : > { %824 = vsyncadd %s809_s11, %s823_s28  ;;  %p936_p10 = scmp.ne.s32.totalorder %s1531_s27, 0  ;;  %s950_s23 = smul.u32 5120, %s1137_s16 }
 0x25a   : > { %s830_s30 = sshll.u32 %s1485_s19, 4  ;;  %s1093_s29 = smov [#allocation5]   ;;  %s1544_s30 = int_to_ptr.vmem [resolvable:$true] %s830_s30 }
 0x25b   : > { %s1542_s8 = scalar_lea.hbm %s1592_s3, %s950_s23  ;;  %s1023_s17 = scalar_lea.vmem %s1544_s30, %s1531_s27 }
 0x25c   : > { %p1024_p9 = scmp.ne.s32.totalorder %s1544_s30, %s1023_s17  ;;  %s1027_s4 = sshll.u32 %s1093_s29, 4  ;;  %s1028_s4 = int_to_ptr.vmem [resolvable:$false] %s1027_s4 }
 0x25d   : > { %s1029_s16 = scalar_lea.vmem %s1028_s4, 10240  ;;  %p1030_p7 = scmp.lt.s32.totalorder %s1544_s30, %s1028_s4 }
 0x25e   : > { %p1025_p11 = pnand %p1024_p9, %p936_p10  ;;  %p1031_p8 = scmp.lt.s32.totalorder %s1029_s16, %s1023_s17 }
 0x260   : > { %p1026_p13 = pneg %p1025_p11  ;;  %p1032_p12 = por %p1031_p8, %p1030_p7 }
 0x262   : > { %p1033_p0 = pnand %p1032_p12, %p1026_p13 }
 0x264   : > { %1036 = shalt.err (!%p1033_p0)
}
 0x265   : > { %s1037_s7 = scalar_lea.hbm %s1542_s8, %s1531_s27  ;;  %s1041_s22 = scalar_lea.hbm %s1592_s3, 9728 }
 0x266   : > { %p1038_p1 = scmp.ne.s32.totalorder %s1542_s8, %s1037_s7  ;;  %p1042_p4 = scmp.lt.s32.totalorder %s1542_s8, %s1592_s3 }
 0x267   : > { %p1043_p5 = scmp.lt.s32.totalorder %s1041_s22, %s1037_s7 }
 0x268   : > { %p1039_p3 = pnand %p1038_p1, %p936_p10 }
 0x269   : > { %p1044_p6 = por %p1043_p5, %p1042_p4 }
 0x26a   : > { %p1040_p2 = pneg %p1039_p3 }
 0x26c   : > { %p1045_p9 = pnand %p1044_p6, %p1040_p2 }
 0x26e   : > { %1048 = shalt.err (!%p1045_p9)
}
 0x26f   : > { %s1094_s26 = smov 256   ;;  %s1095_s28 = smov 16  }
 0x270   : > { %836 = dma.vmem_to_hbm [thread:$0]  (%p936_p10), %s1544_s30, %s1531_s27, %s1542_s8, %s809_s11, %s1094_s26, %s1094_s26, %s1095_s28  }
 0x271 PF: > { %s845_s23 = sand.u32 1, %s1075_s12   ;;  %p1597_p11 = scmp.ne.s32.totalorder %s1596_s24, 0 }
 0x272   : > { %p1598_p13 = scmp.ge.s32.totalorder %s1087_s15, 2  ;;  %s846_s5 = scalar_lea.sflag [#allocation4], %s845_s23 }
 0x274   : > { %p956_p7 = pnand %p1598_p13, %p1597_p11 }
 0x276   : > { %p957_p8 = pneg %p956_p7 }
 0x278   : > { %1070 = dma.done.wait (%p957_p8), %s846_s5, 5120  }
 0x279   : > { %1072 = vsyncadd (%p957_p8), %s846_s5, 4294962176  ;;  %p16_p12 = scmp.ge.s32.totalorder %s1141_s18, 4   ;;  %s1599_s12 = smov %s1079_s13 }
 0x27a   : > { %s1600_s13 = smov %s1083_s14  ;;  %s1601_s14 = smov %s1153_s21 }
 0x27b   : > { %s1602_s15 = smov %s1141_s18  ;;  %18 = sbr.rel (!%p16_p12) target bundleno = 5 (0x5), region = 77 }
 0x280   :  { %851 = vsyncpa [#allocation3], 1 }
 0x281   :  { %853 = vsyncpa [#allocation3 + $0x1], 1 }
 0x282   :  { %854 = vsyncpa [#allocation4], 1 }
 0x283   :  { %856 = vsyncpa [#allocation4 + $0x1], 1 }

</bundles_post_ra>
